<compile_context>
chip_gen: v7x
topology: tpu7x:2x2x1
jax: 0.10.0
libtpu: 0.0.40
codegen_flags: <defaults>
</compile_context>

<pallas_src>
import functools

import jax
import jax.numpy as jnp
from jax import lax
from jax.experimental import pallas as pl
from jax.experimental.pallas import tpu as pltpu

P = 128  # lane-dense padded feature width (embedding_dim / hidden_units <= 128)


def _round_up(x, m):
    return ((x + m - 1) // m) * m


def _pad2(x, rows, cols):
    return jnp.pad(x, ((0, rows - x.shape[0]), (0, cols - x.shape[1])))


def _pick_tile(n_pad, target):
    """Largest multiple of 128 <= target that divides n_pad (n_pad % 128 == 0)."""
    t = min(target, n_pad)
    t = (t // 128) * 128
    while t > 128 and n_pad % t != 0:
        t -= 128
    return max(t, 128)


# ------------------------- Pallas kernel: all NGCF layers, fused -------------------------
def ngcf_all_layers_kernel(a_ref, ego0_ref, w_ref, b_ref, norm_ref,
                           ego_scr, side_acc, *, n_pad, tm, tk):
    """Grid (L, I, K):  L = layer (sequential), I = row block, K = A_hat col block.

    side = A_hat @ ego                                (bf16 MXU, f32 acc over K)
    h    = side @ W_gc + (ego*side) @ W_bi + (b_gc + b_bi)   (two MXU dots)
    ego' = LeakyReLU(h, 0.2)                          (message dropout 0 -> id)
    norm = ego' * rsqrt(max(sum(ego'^2), 1e-24))      == F.normalize(p=2, eps=1e-12)
    """
    l = pl.program_id(0)
    i = pl.program_id(1)
    k = pl.program_id(2)
    k_last = pl.num_programs(2) - 1

    slot_in = lax.rem(l, 2)        # ego carry slot holding layer-l input
    slot_out = lax.rem(l + 1, 2)   # ego carry slot receiving layer-l output
    in_base = slot_in * n_pad
    out_base = slot_out * n_pad

    # Stage layer-0 ego (concatenated user/item embeddings, bf16) into slot 0 of
    # the VMEM carry. Only the first row block of layer 0 does this; afterwards
    # the ego0 BlockSpec index freezes so its HBM DMA is elided.
    @pl.when((l == 0) & (i == 0))
    def _():
        ego_scr[pl.ds(pl.multiple_of(k * tk, 128), tk), :] = ego0_ref[...]

    # ---- side = A_hat @ ego, accumulated over K blocks ----
    @pl.when(k == 0)
    def _():
        side_acc[...] = jnp.zeros_like(side_acc)

    e_k = ego_scr[pl.ds(pl.multiple_of(in_base + k * tk, 128), tk), :]   # bf16
    side_acc[...] += jnp.dot(a_ref[...], e_k, preferred_element_type=jnp.float32)

    # ---- epilogue on the last K step ----
    @pl.when(k == k_last)
    def _():
        side = side_acc[...]                                             # f32 (tm, P)
        e_i = ego_scr[pl.ds(pl.multiple_of(in_base + i * tm, 128), tm), :]  # bf16
        w = w_ref[0]                                                     # (2P, P) bf16

        # Two MXU dots, no staging scratch: [W_gc; W_bi] is split statically.
        bi = (e_i.astype(jnp.float32) * side).astype(jnp.bfloat16)
        h = (jnp.dot(side.astype(jnp.bfloat16), w[:P, :],
                     preferred_element_type=jnp.float32)
             + jnp.dot(bi, w[P:, :], preferred_element_type=jnp.float32)
             + b_ref[0])
        ego_new = jnp.where(h >= 0.0, h, 0.2 * h)                        # LeakyReLU(0.2)

        # Carry new ego in VMEM (bf16) for the next layer; never written to HBM.
        ego_scr[pl.ds(pl.multiple_of(out_base + i * tm, 128), tm), :] = (
            ego_new.astype(jnp.bfloat16))

        # Row-wise L2 normalize via rsqrt (EUP); clamp matches F.normalize eps=1e-12.
        sumsq = jnp.sum(ego_new * ego_new, axis=1, keepdims=True)
        inv = lax.rsqrt(jnp.maximum(sumsq, 1e-24))
        norm_ref[0] = (ego_new * inv).astype(norm_ref.dtype)


def ngcf_propagate(a_hat_bf16, ego0_bf16, w_cat_bf16, b_cat_f32, *, tm=512, tk=2048):
    """All NGCF propagation layers in a single fused pallas_call.

    a_hat_bf16 : (N_pad, N_pad) bf16   ego0_bf16 : (N_pad, P) bf16
    w_cat_bf16 : (L, 2P, P)     bf16   b_cat_f32 : (L, 1, P)  f32
    Returns (L, N_pad, P) bf16 normalized embeddings per layer.
    """
    n_pad = a_hat_bf16.shape[0]
    num_layers = w_cat_bf16.shape[0]
    assert n_pad % 128 == 0

    tm = _pick_tile(n_pad, tm)
    tk = _pick_tile(n_pad, tk)
    assert n_pad % tm == 0 and n_pad % tk == 0
    assert tm % 128 == 0 and tk % 128 == 0   # alignment hints rely on this

    grid = (num_layers, n_pad // tm, n_pad // tk)
    kernel = functools.partial(ngcf_all_layers_kernel, n_pad=n_pad, tm=tm, tk=tk)

    # VMEM budget (double-buffered pipeline buffers + resident scratch) + headroom.
    need = (
        2 * tm * tk * 2          # A_hat tiles (bf16, double buffered)
        + 2 * tk * P * 2         # ego0 tiles (bf16, double buffered)
        + 2 * (2 * P * P * 2)    # [W_gc; W_bi] (bf16, double buffered)
        + 2 * (P * 4)            # bias (f32, double buffered)
        + 2 * tm * P * 2         # output tiles (bf16, double buffered)
        + 2 * n_pad * P * 2      # ego ping-pong carry (bf16)
        + tm * P * 4             # side accumulator (f32)
    )
    vmem_limit = int(min(max(32 * 1024 * 1024, need * 3 // 2 + (4 << 20)),
                         100 * 1024 * 1024))

    def ego0_index_map(l, i, k):
        # Stream ego0 only during the (l==0, i==0) staging sweep; freeze the
        # block index afterwards so Pallas elides the redundant DMA.
        return (jnp.where((l == 0) & (i == 0), k, 0), 0)

    return pl.pallas_call(
        kernel,
        out_shape=jax.ShapeDtypeStruct((num_layers, n_pad, P), jnp.bfloat16),
        grid_spec=pltpu.PrefetchScalarGridSpec(
            num_scalar_prefetch=0,
            grid=grid,
            in_specs=[
                pl.BlockSpec((tm, tk), lambda l, i, k: (i, k)),          # A_hat tiles
                pl.BlockSpec((tk, P), ego0_index_map),                   # layer-0 ego
                pl.BlockSpec((1, 2 * P, P), lambda l, i, k: (l, 0, 0)),  # [W_gc; W_bi]
                pl.BlockSpec((1, 1, P), lambda l, i, k: (l, 0, 0)),      # b_gc + b_bi
            ],
            out_specs=pl.BlockSpec((1, tm, P), lambda l, i, k: (l, i, 0)),
            scratch_shapes=[
                pltpu.VMEM((2 * n_pad, P), jnp.bfloat16),  # ego carry (ping-pong)
                pltpu.VMEM((tm, P), jnp.float32),          # side accumulator
            ],
        ),
        compiler_params=pltpu.CompilerParams(
            # Layer and row axes carry a dependency through the ego VMEM carry,
            # so every grid axis must stay sequential ("arbitrary").
            dimension_semantics=("arbitrary", "arbitrary", "arbitrary"),
            vmem_limit_bytes=vmem_limit,
        ),
    )(a_hat_bf16, ego0_bf16, w_cat_bf16, b_cat_f32)


# ------------------------- parameter / graph construction -------------------------
def xavier_uniform(key, shape):
    fan_a, fan_b = shape[0], shape[1]
    bound = (6.0 / (fan_a + fan_b)) ** 0.5
    return jax.random.uniform(key, shape, jnp.float32, -bound, bound)


def build_normalized_adjacency(key, user_num, item_num, density=0.3):
    # Test-data stand-in for the pre-normalized sparse graph `g` passed to NGCFModel.
    n = user_num + item_num
    r = (jax.random.uniform(key, (user_num, item_num)) < density).astype(jnp.float32)
    a = jnp.zeros((n, n), jnp.float32)
    a = a.at[:user_num, user_num:].set(r)
    a = a.at[user_num:, :user_num].set(r.T)
    deg = jnp.sum(a, axis=1)
    d_inv_sqrt = jnp.where(deg > 0, 1.0 / jnp.sqrt(jnp.maximum(deg, 1e-12)), 0.0)
    return d_inv_sqrt[:, None] * a * d_inv_sqrt[None, :]


# ------------------------- full NGCF forward (train branch) -------------------------
def ngcf_forward(a_hat, user_emb, item_emb, layer_weights, data,
                 user_num, decay, batch_size):
    n = a_hat.shape[0]
    n_pad = _round_up(max(n, 8), 128)

    ego0 = jnp.concatenate([user_emb, item_emb], axis=0)            # (N, D)
    ego0_pad = _pad2(ego0, n_pad, P).astype(jnp.bfloat16)
    a_pad = _pad2(a_hat, n_pad, n_pad).astype(jnp.bfloat16)

    w_list, b_list, out_dims = [], [], []
    for (w_gc, b_gc, w_bi, b_bi) in layer_weights:
        w_list.append(jnp.concatenate([_pad2(w_gc, P, P), _pad2(w_bi, P, P)], axis=0))
        b_list.append(_pad2(b_gc, 1, P) + _pad2(b_bi, 1, P))
        out_dims.append(w_gc.shape[1])
    w_cat = jnp.stack(w_list).astype(jnp.bfloat16)                  # (L, 2P, P)
    b_cat = jnp.stack(b_list).astype(jnp.float32)                   # (L, 1, P)

    norms = ngcf_propagate(a_pad, ego0_pad, w_cat, b_cat)           # (L, n_pad, P) bf16

    parts = [ego0]
    for li, d_out in enumerate(out_dims):
        parts.append(norms[li, :n, :d_out].astype(jnp.float32))
    all_embeddings = jnp.concatenate(parts, axis=1)

    u_g_embeddings = all_embeddings[:user_num, :]
    i_g_embeddings = all_embeddings[user_num:, :]

    u = u_g_embeddings[data["user_id"], :]
    p = i_g_embeddings[data["item_id"], :]
    ng = i_g_embeddings[data["neg_item_id"], :]

    # BPRLoss (standard NGCF definition): -mean(logsigmoid(pos - neg))
    # TODO(synk): BPRLoss / L2RegLoss class bodies are not in the reference;
    # the canonical NGCF formulas are used here (tiny gathers, kept in plain JAX).
    pos_scores = jnp.sum(u * p, axis=1)
    neg_scores = jnp.sum(u * ng, axis=1)
    batch_bpr_loss = -jnp.mean(jax.nn.log_sigmoid(pos_scores - neg_scores))

    ue = user_emb[data["user_id"], :]
    pe = item_emb[data["item_id"], :]
    ne = item_emb[data["neg_item_id"], :]
    regularizer = 0.5 * (jnp.sum(ue * ue) + jnp.sum(pe * pe) + jnp.sum(ne * ne))
    batch_reg_loss = decay * regularizer / batch_size

    return {
        "loss": batch_bpr_loss + batch_reg_loss,
        "batch_bpr_loss": batch_bpr_loss,
        "batch_reg_loss": batch_reg_loss,
        "user_embedding": u_g_embeddings,
        "item_embedding": i_g_embeddings,
    }


# ------------------------- main -------------------------
if __name__ == "__main__":
    user_num, item_num = 8, 8
    embedding_dim = 32
    hidden_units = [32, 32]
    decay = 1e-4
    batch_size = 4

    key = jax.random.PRNGKey(0)
    n_wkeys = 4 * len(hidden_units)
    keys = jax.random.split(key, 4 + n_wkeys)
    k_adj, k_u, k_i, k_data = keys[0], keys[1], keys[2], keys[3]
    wkeys = keys[4:]

    a_hat = build_normalized_adjacency(k_adj, user_num, item_num)

    user_emb = xavier_uniform(k_u, (user_num, embedding_dim))
    item_emb = xavier_uniform(k_i, (item_num, embedding_dim))

    layers = [embedding_dim] + hidden_units
    layer_weights = []
    for k in range(len(hidden_units)):
        kw = wkeys[4 * k:4 * k + 4]
        w_gc = xavier_uniform(kw[0], (layers[k], layers[k + 1]))
        b_gc = xavier_uniform(kw[1], (1, layers[k + 1]))
        w_bi = xavier_uniform(kw[2], (layers[k], layers[k + 1]))
        b_bi = xavier_uniform(kw[3], (1, layers[k + 1]))
        layer_weights.append((w_gc, b_gc, w_bi, b_bi))

    kd1, kd2, kd3 = jax.random.split(k_data, 3)
    data = {
        "user_id": jax.random.randint(kd1, (batch_size,), 0, user_num),
        "item_id": jax.random.randint(kd2, (batch_size,), 0, item_num),
        "neg_item_id": jax.random.randint(kd3, (batch_size,), 0, item_num),
    }

    out = ngcf_forward(a_hat, user_emb, item_emb, layer_weights, data,
                       user_num, decay, batch_size)
    jax.block_until_ready(out["loss"])
    jax.block_until_ready(out["user_embedding"])
    print("KERNEL_OK")
</pallas_src>

<mosaic_0001>
module attributes {stable_mosaic.version = 11 : i64} {
  func.func @ngcf_all_layers_kernel(%arg0: i32, %arg1: i32, %arg2: i32, %arg3: memref<128x128xbf16, #tpu.memory_space<vmem>>, %arg4: memref<128x128xbf16, #tpu.memory_space<vmem>>, %arg5: memref<1x256x128xbf16, #tpu.memory_space<vmem>>, %arg6: memref<1x1x128xf32, #tpu.memory_space<vmem>>, %arg7: memref<1x128x128xbf16, #tpu.memory_space<vmem>>, %arg8: memref<256x128xbf16, #tpu.memory_space<vmem>>, %arg9: memref<128x128xf32, #tpu.memory_space<vmem>>) attributes {dimension_semantics = [#tpu.dimension_semantics<arbitrary>, #tpu.dimension_semantics<arbitrary>, #tpu.dimension_semantics<arbitrary>], iteration_bounds = array<i64: 2, 1, 1>, scalar_prefetch = 0 : i64, scratch_operands = 2 : i64, tpu.core_type = #tpu.core_type<tc>, window_params = [{transform_indices = @transform_0, window_bounds = array<i64: 128, 128>}, {transform_indices = @transform_1, window_bounds = array<i64: 128, 128>}, {transform_indices = @transform_2, window_bounds = array<i64: 1, 256, 128>}, {transform_indices = @transform_3, window_bounds = array<i64: 1, 1, 128>}, {transform_indices = @transform_4, window_bounds = array<i64: 1, 128, 128>}]} {
    %c2_i32 = arith.constant 2 : i32
    %0 = arith.remsi %arg0, %c2_i32 : i32
    %c1_i32 = arith.constant 1 : i32
    %1 = arith.addi %arg0, %c1_i32 : i32
    %c2_i32_0 = arith.constant 2 : i32
    %2 = arith.remsi %1, %c2_i32_0 : i32
    %c128_i32 = arith.constant 128 : i32
    %3 = arith.muli %0, %c128_i32 : i32
    %c128_i32_1 = arith.constant 128 : i32
    %4 = arith.muli %2, %c128_i32_1 : i32
    %c0_i32 = arith.constant 0 : i32
    %5 = arith.cmpi eq, %arg0, %c0_i32 : i32
    %c0_i32_2 = arith.constant 0 : i32
    %6 = arith.cmpi eq, %arg1, %c0_i32_2 : i32
    %7 = arith.andi %5, %6 : i1
    %8 = arith.extui %7 : i1 to i32
    %c0_i32_3 = arith.constant 0 : i32
    %9 = arith.cmpi ne, %8, %c0_i32_3 : i32
    scf.if %9 {
      %c0_15 = arith.constant 0 : index
      %c0_16 = arith.constant 0 : index
      %26 = vector.load %arg4[%c0_15, %c0_16] : memref<128x128xbf16, #tpu.memory_space<vmem>>, vector<128x128xbf16>
      %c128_i32_17 = arith.constant 128 : i32
      %27 = arith.muli %arg2, %c128_i32_17 : i32
      %28 = tpu.assume_multiple %27, 128 : i32
      %29 = arith.index_cast %28 : i32 to index
      %c0_18 = arith.constant 0 : index
      %30 = vector.load %arg8[%29, %c0_18] : memref<256x128xbf16, #tpu.memory_space<vmem>>, vector<128x128xbf16>
      tpu.vector_store %arg8[%29, %c0_18], %26 {strides = array<i32>} : memref<256x128xbf16, #tpu.memory_space<vmem>>, vector<128x128xbf16>,
    } else {
    }
    %c0_i32_4 = arith.constant 0 : i32
    %10 = arith.cmpi eq, %arg2, %c0_i32_4 : i32
    %11 = arith.extui %10 : i1 to i32
    %c0_i32_5 = arith.constant 0 : i32
    %12 = arith.cmpi ne, %11, %c0_i32_5 : i32
    scf.if %12 {
      %cst_15 = arith.constant 0.000000e+00 : f32
      %26 = vector.broadcast %cst_15 : f32 to vector<128x128xf32>
      %c0_16 = arith.constant 0 : index
      %c0_17 = arith.constant 0 : index
      %27 = vector.load %arg9[%c0_16, %c0_17] : memref<128x128xf32, #tpu.memory_space<vmem>>, vector<128x128xf32>
      tpu.vector_store %arg9[%c0_16, %c0_17], %26 {strides = array<i32>} : memref<128x128xf32, #tpu.memory_space<vmem>>, vector<128x128xf32>,
    } else {
    }
    %c128_i32_6 = arith.constant 128 : i32
    %13 = arith.muli %arg2, %c128_i32_6 : i32
    %14 = arith.addi %3, %13 : i32
    %15 = tpu.assume_multiple %14, 128 : i32
    %16 = arith.index_cast %15 : i32 to index
    %c0 = arith.constant 0 : index
    %17 = vector.load %arg8[%16, %c0] : memref<256x128xbf16, #tpu.memory_space<vmem>>, vector<128x128xbf16>
    %c0_7 = arith.constant 0 : index
    %c0_8 = arith.constant 0 : index
    %18 = vector.load %arg9[%c0_7, %c0_8] : memref<128x128xf32, #tpu.memory_space<vmem>>, vector<128x128xf32>
    %c0_9 = arith.constant 0 : index
    %c0_10 = arith.constant 0 : index
    %19 = vector.load %arg3[%c0_9, %c0_10] : memref<128x128xbf16, #tpu.memory_space<vmem>>, vector<128x128xbf16>
    %cst = arith.constant dense<0.000000e+00> : vector<128x128xf32>
    %20 = tpu.matmul %19, %17, %cst {dimension_numbers = #tpu.dot_dimension_numbers<[1], [0], [0], [1], [0, 0, 1, 1], [], []>} : vector<128x128xbf16>, vector<128x128xbf16>, vector<128x128xf32> -> vector<128x128xf32>
    %21 = arith.addf %18, %20 : vector<128x128xf32>
    %c0_11 = arith.constant 0 : index
    %c0_12 = arith.constant 0 : index
    %22 = vector.load %arg9[%c0_11, %c0_12] : memref<128x128xf32, #tpu.memory_space<vmem>>, vector<128x128xf32>
    tpu.vector_store %arg9[%c0_11, %c0_12], %21 {strides = array<i32>} : memref<128x128xf32, #tpu.memory_space<vmem>>, vector<128x128xf32>,
    %c0_i32_13 = arith.constant 0 : i32
    %23 = arith.cmpi eq, %arg2, %c0_i32_13 : i32
    %24 = arith.extui %23 : i1 to i32
    %c0_i32_14 = arith.constant 0 : i32
    %25 = arith.cmpi ne, %24, %c0_i32_14 : i32
    scf.if %25 {
      %c0_15 = arith.constant 0 : index
      %c0_16 = arith.constant 0 : index
      %26 = vector.load %arg9[%c0_15, %c0_16] : memref<128x128xf32, #tpu.memory_space<vmem>>, vector<128x128xf32>
      %c128_i32_17 = arith.constant 128 : i32
      %27 = arith.muli %arg1, %c128_i32_17 : i32
      %28 = arith.addi %3, %27 : i32
      %29 = tpu.assume_multiple %28, 128 : i32
      %30 = arith.index_cast %29 : i32 to index
      %c0_18 = arith.constant 0 : index
      %31 = vector.load %arg8[%30, %c0_18] : memref<256x128xbf16, #tpu.memory_space<vmem>>, vector<128x128xbf16>
      %c0_19 = arith.constant 0 : index
      %c0_20 = arith.constant 0 : index
      %c0_21 = arith.constant 0 : index
      %32 = vector.load %arg5[%c0_19, %c0_20, %c0_21] : memref<1x256x128xbf16, #tpu.memory_space<vmem>>, vector<1x256x128xbf16>
      %33 = vector.shape_cast %32 : vector<1x256x128xbf16> to vector<256x128xbf16>
      %34 = arith.extf %31 : vector<128x128xbf16> to vector<128x128xf32>
      %35 = arith.mulf %34, %26 : vector<128x128xf32>
      %36 = arith.truncf %35 : vector<128x128xf32> to vector<128x128xbf16>
      %37 = arith.truncf %26 : vector<128x128xf32> to vector<128x128xbf16>
      %38 = vector.extract_strided_slice %33 {offsets = [0, 0], sizes = [128, 128], strides = [1, 1]} : vector<256x128xbf16> to vector<128x128xbf16>
      %cst_22 = arith.constant dense<0.000000e+00> : vector<128x128xf32>
      %39 = tpu.matmul %37, %38, %cst_22 {dimension_numbers = #tpu.dot_dimension_numbers<[1], [0], [0], [1], [0, 0, 1, 1], [], []>} : vector<128x128xbf16>, vector<128x128xbf16>, vector<128x128xf32> -> vector<128x128xf32>
      %40 = vector.extract_strided_slice %33 {offsets = [128, 0], sizes = [128, 128], strides = [1, 1]} : vector<256x128xbf16> to vector<128x128xbf16>
      %cst_23 = arith.constant dense<0.000000e+00> : vector<128x128xf32>
      %41 = tpu.matmul %36, %40, %cst_23 {dimension_numbers = #tpu.dot_dimension_numbers<[1], [0], [0], [1], [0, 0, 1, 1], [], []>} : vector<128x128xbf16>, vector<128x128xbf16>, vector<128x128xf32> -> vector<128x128xf32>
      %42 = arith.addf %39, %41 : vector<128x128xf32>
      %c0_24 = arith.constant 0 : index
      %c0_25 = arith.constant 0 : index
      %c0_26 = arith.constant 0 : index
      %43 = vector.load %arg6[%c0_24, %c0_25, %c0_26] : memref<1x1x128xf32, #tpu.memory_space<vmem>>, vector<1x1x128xf32>
      %44 = vector.shape_cast %43 : vector<1x1x128xf32> to vector<1x128xf32>
      %45 = vector.broadcast %44 : vector<1x128xf32> to vector<128x128xf32>
      %46 = arith.addf %42, %45 : vector<128x128xf32>
      %cst_27 = arith.constant 0.000000e+00 : f32
      %47 = vector.broadcast %cst_27 : f32 to vector<128x128xf32>
      %48 = arith.cmpf oge, %46, %47 : vector<128x128xf32>
      %cst_28 = arith.constant 2.000000e-01 : f32
      %49 = vector.broadcast %cst_28 : f32 to vector<128x128xf32>
      %50 = arith.mulf %49, %46 : vector<128x128xf32>
      %51 = arith.select %48, %46, %50 : vector<128x128xi1>, vector<128x128xf32>
      %52 = arith.truncf %51 : vector<128x128xf32> to vector<128x128xbf16>
      %c128_i32_29 = arith.constant 128 : i32
      %53 = arith.muli %arg1, %c128_i32_29 : i32
      %54 = arith.addi %4, %53 : i32
      %55 = tpu.assume_multiple %54, 128 : i32
      %56 = arith.index_cast %55 : i32 to index
      %c0_30 = arith.constant 0 : index
      %57 = vector.load %arg8[%56, %c0_30] : memref<256x128xbf16, #tpu.memory_space<vmem>>, vector<128x128xbf16>
      tpu.vector_store %arg8[%56, %c0_30], %52 {strides = array<i32>} : memref<256x128xbf16, #tpu.memory_space<vmem>>, vector<128x128xbf16>,
      %58 = arith.mulf %51, %51 : vector<128x128xf32>
      %cst_31 = arith.constant dense<0.000000e+00> : vector<128xf32>
      %59 = vector.multi_reduction <add>, %58, %cst_31 [1] : vector<128x128xf32> to vector<128xf32>
      %60 = vector.shape_cast %59 : vector<128xf32> to vector<128x1xf32>
      %cst_32 = arith.constant 1.000000e-24 : f32
      %61 = vector.broadcast %cst_32 : f32 to vector<128x1xf32>
      %62 = arith.maximumf %60, %61 : vector<128x1xf32>
      %63 = math.rsqrt %62 : vector<128x1xf32>
      %64 = vector.broadcast %63 : vector<128x1xf32> to vector<128x128xf32>
      %65 = arith.mulf %51, %64 : vector<128x128xf32>
      %66 = arith.truncf %65 : vector<128x128xf32> to vector<128x128xbf16>
      %c0_33 = arith.constant 0 : index
      %c0_34 = arith.constant 0 : index
      %c0_35 = arith.constant 0 : index
      %67 = vector.load %arg7[%c0_33, %c0_34, %c0_35] : memref<1x128x128xbf16, #tpu.memory_space<vmem>>, vector<1x128x128xbf16>
      %68 = vector.shape_cast %67 : vector<1x128x128xbf16> to vector<128x128xbf16>
      %69 = vector.shape_cast %66 : vector<128x128xbf16> to vector<1x128x128xbf16>
      tpu.vector_store %arg7[%c0_33, %c0_34, %c0_35], %69 {strides = array<i32>} : memref<1x128x128xbf16, #tpu.memory_space<vmem>>, vector<1x128x128xbf16>,
    } else {
    }
    return
  }
  func.func @transform_0(%arg0: i32, %arg1: i32, %arg2: i32) -> (i32, i32) {
    %c0_i32 = arith.constant 0 : i32
    return %arg1, %arg2 : i32, i32
  }
  func.func @transform_1(%arg0: i32, %arg1: i32, %arg2: i32) -> (i32, i32) {
    %c0_i32 = arith.constant 0 : i32
    %0 = arith.cmpi eq, %arg0, %c0_i32 : i32
    %c0_i32_0 = arith.constant 0 : i32
    %1 = arith.cmpi eq, %arg1, %c0_i32_0 : i32
    %2 = arith.andi %0, %1 : i1
    %c0_i32_1 = arith.constant 0 : i32
    %3 = arith.select %2, %arg2, %c0_i32_1 : i32
    %c0_i32_2 = arith.constant 0 : i32
    %c0_i32_3 = arith.constant 0 : i32
    return %3, %c0_i32_2 : i32, i32
  }
  func.func @transform_2(%arg0: i32, %arg1: i32, %arg2: i32) -> (i32, i32, i32) {
    %c0_i32 = arith.constant 0 : i32
    %c0_i32_0 = arith.constant 0 : i32
    %c0_i32_1 = arith.constant 0 : i32
    return %arg0, %c0_i32, %c0_i32_0 : i32, i32, i32
  }
  func.func @transform_3(%arg0: i32, %arg1: i32, %arg2: i32) -> (i32, i32, i32) {
    %c0_i32 = arith.constant 0 : i32
    %c0_i32_0 = arith.constant 0 : i32
    %c0_i32_1 = arith.constant 0 : i32
    return %arg0, %c0_i32, %c0_i32_0 : i32, i32, i32
  }
  func.func @transform_4(%arg0: i32, %arg1: i32, %arg2: i32) -> (i32, i32, i32) {
    %c0_i32 = arith.constant 0 : i32
    %c0_i32_0 = arith.constant 0 : i32
    return %arg0, %arg1, %c0_i32 : i32, i32, i32
  }
}

</mosaic_0001>

<bundles_post_ra>
// kernel: tpu_custom_call.1
= control target key start
LH: loop header
LB: loop body
LE: loop exit
PB: predicated region body
PF: predicated region fallthrough
CT: control target
= control target key end

     0   :  { %s2734_s0 = inlined_call_operand.hbm [shape: bf16[128,128], index: 0, kind: input, shape index: {}]   ;;  %s2735_s1 = inlined_call_operand.hbm [shape: bf16[128,128], index: 1, kind: input, shape index: {}]   ;;  %s2736_s2 = inlined_call_operand.hbm [shape: bf16[2,256,128], index: 2, kind: input, shape index: {}]   ;;  %s2737_s3 = inlined_call_operand.vmem [shape: f32[2,1,128], index: 3, kind: input, shape index: {}]   ;;  %s2738_s4 = inlined_call_operand.hbm [shape: bf16[2,128,128], index: 4, kind: output, shape index: {}]  }
   0x1   :  { %2752 = sst [smem:[#allocation16_spill]] %s2734_s0 }
   0x2   :  { %2753 = sst [smem:[#allocation17_spill]] %s2735_s1 }
   0x3   :  { %9 = vsyncpa [#allocation5], 0 }
   0x4   :  { %10 = vsyncpa [#allocation8], 0 }
   0x5   :  { %12 = vsyncpa [#allocation8 + $0x1], 0 }
   0x6   :  { %13 = vsyncpa [#allocation6], 0 }
   0x7   :  { %15 = vsyncpa [#allocation6 + $0x1], 0  ;;  %s2192_s15 = smov 0   ;;  %s2194_s16 = smov 0  }
   0x8   :  { %s2196_s17 = smov 0   ;;  %s2198_s18 = smov 0  }
   0x9   :  { %s2200_s19 = smov 0   ;;  %s2202_s20 = smov 0  }
   0xa LB: > { %2754 = sst [smem:[#allocation15_spill]] %s2157_s20  ;;  %p2740_p0 = scmp.eq.s32.totalorder %s2157_s20, 0  ;;  %s2157_s20 = sphi %s2202_s20, %s21_s20   ;;  %s2153_s19 = sphi %s2200_s19, %s2785_s19   ;;  %s2149_s18 = sphi %s2198_s18, %s2784_s18   ;;  %s2145_s17 = sphi %s2196_s17, %s2783_s17   ;;  %s2141_s16 = sphi %s2194_s16, %s2782_s16   ;;  %s2137_s15 = sphi %s2192_s15, %s2781_s15  }
   0xb   : > { %p2739_p2 = scmp.lt.s32.totalorder %s2157_s20, 2  ;;  %s219_s21 = sand.u32 1, %s2157_s20  }
   0xc   : > { %s2159_s22 = smov [#allocation7]   ;;  %s2234_s25 = scalar_lea.sflag [#allocation8], %s219_s21 }
   0xd   : > { %s235_s23 = sshll.u32 %s2159_s22, 4  ;;  %p2230_p3 = pnand %p2739_p2, %p2740_p0  ;;  %s236_s23 = int_to_ptr.vmem [resolvable:$true] %s235_s23 }
   0xe   : > { %s2756_s1 = sld [smem:[#allocation17_spill]] }
   0xf   : > { %p1983_p5 = pneg %p2230_p3 }
  0x14   : > { %s1981_s28 = scalar_lea.hbm %s2756_s1, 1024 }
  0x15   : > { %p1982_p4 = scmp.ne.s32.totalorder %s2756_s1, %s1981_s28  ;;  %p1988_p8 = scmp.lt.u32.totalorder %s1981_s28, %s2756_s1 }
  0x17   : > { %p1984_p6 = pnand %p1983_p5, %p1982_p4 }
  0x19   : > { %p1985_p7 = pneg %p1984_p6 }
  0x1b   : > { %p1990_p9 = pnand %p1988_p8, %p1985_p7 }
  0x1d   : > { %1993 = shalt.err (!%p1990_p9)
}
  0x1e   : > { %s1994_s7 = scalar_lea.vmem %s236_s23, 1024  ;;  %s2001_s8 = scalar_lea.vmem %s236_s23, 2048 }
  0x1f   : > { %p1995_p10 = scmp.ne.s32.totalorder %s236_s23, %s1994_s7  ;;  %p2002_p13 = scmp.lt.s32.totalorder %s236_s23, %s236_s23 }
  0x20   : > { %p2003_p1 = scmp.lt.s32.totalorder %s2001_s8, %s1994_s7 }
  0x21   : > { %p1997_p11 = pnand %p1995_p10, %p1983_p5 }
  0x22   : > { %p2004_p2 = por %p2003_p1, %p2002_p13 }
  0x23   : > { %p1998_p12 = pneg %p1997_p11 }
  0x25   : > { %p2005_p0 = pnand %p2004_p2, %p1998_p12 }
  0x27   : > { %2008 = shalt.err (!%p2005_p0)
}
  0x28   : > { %s2741_s9 = smov 64   ;;  %s2743_s10 = smov 4  }
  0x29   : > { %1849 = dma.hbm_to_vmem [thread:$0]  (!%p2230_p3), %s2756_s1, 1024, %s236_s23, %s2234_s25, %s2741_s9, %s2741_s9, %s2743_s10  }
  0x2a   : > { %s2257_s13 = sadd.s32 4294967295, %s2157_s20   ;;  %s1507_s14 = sadd.s32 4294967294, %s2157_s20  }
  0x2b   : > { %p118_p0 = scmp.ne.s32.totalorder %s2145_s17, %s2141_s16  ;;  %p124_p1 = scmp.ne.s32.totalorder %s2141_s16, %s2137_s15 }
  0x2c   : > { %p2745_p2 = scmp.eq.s32.totalorder %s2257_s13, 0  ;;  %p2757_p4 = scmp.eq.s32.totalorder %s2157_s20, 0 }
  0x2d   : > { %p176_p6 = scmp.eq.s32.totalorder %s2257_s13, 1  ;;  %p182_p3 = scmp.eq.s32.totalorder %s1507_s14, 1 }
  0x2e   : > { %p120_p5 = por %p2757_p4, %p118_p0  ;;  %p2270_p7 = por %p2745_p2, %p124_p1 }
  0x2f   : > { %p2274_p8 = por %p176_p6, %p118_p0  ;;  %p1510_p9 = scmp.ge.s32.totalorder %s2157_s20, 1 }
  0x30   : > { %s2758_s21 = scalar_select %p2270_p7, 1, 0 }
  0x31   : > { %s2759_s22 = scalar_select %p2274_p8, 1, 0 }
  0x32   : > { %p2279_p10 = por %p182_p3, %p124_p1  ;;  %p189_p11 = scmp.lt.s32.totalorder %s2157_s20, 3 }
  0x33   : > { %s2162_s26 = smov [#allocation4]   ;;  %p2762_p13 = scmp.lt.s32.totalorder %s2157_s20, 2 }
  0x34   : > { %s2760_s23 = scalar_select %p2279_p10, 1, 0 }
  0x35   : > { %p2284_p12 = pnand %p1510_p9, %p189_p11  ;;  %s205_s27 = sshll.u32 %s2162_s26, 4  ;;  %s206_s27 = int_to_ptr.vmem [resolvable:$true] %s205_s27 }
  0x36   : > { %p2290_p4 = pnand %p2762_p13, %p120_p5  ;;  %s40_s30 = sadd.s32 1, %s2153_s19 }
  0x37   : > { %s2761_s24 = scalar_select %p2284_p12, 1, 0 }
  0x38   : > { %s2763_s28 = scalar_select %p2290_p4, 1, 0 }
  0x39   : > { %p1842_p0 = pneg %p2284_p12  ;;  %p2303_p6 = scmp.ge.s32.totalorder %s40_s30, 2 }
  0x3a   : > { %s111_s6 = sadd.s32 1, %s2145_s17  ;;  %s247_s7 = sand.u32 1, %s2145_s17  }
  0x3b   : > { %p2298_p1 = pnand %p1842_p0, %p2745_p2  ;;  %s2766_s0 = sld [smem:[#allocation16_spill]] }
  0x3c   : > { %s2765_s5 = scalar_select %p2303_p6, 1, 0 }
  0x3d   : > { %p2011_p3 = pneg %p2298_p1 }
  0x41   : > { %s2009_s12 = scalar_lea.hbm %s2766_s0, 1024 }
  0x42   : > { %p2010_p5 = scmp.ne.s32.totalorder %s2766_s0, %s2009_s12  ;;  %p2016_p13 = scmp.lt.u32.totalorder %s2009_s12, %s2766_s0 }
  0x44   : > { %p2012_p9 = pnand %p2011_p3, %p2010_p5 }
  0x46   : > { %p2013_p11 = pneg %p2012_p9 }
  0x48   : > { %p2018_p0 = pnand %p2016_p13, %p2013_p11 }
  0x4a   : > { %2021 = shalt.err (!%p2018_p0)
}
  0x4b   : > { %s2022_s1 = scalar_lea.vmem %s206_s27, 1024  ;;  %p2030_p7 = scmp.lt.s32.totalorder %s206_s27, %s206_s27 }
  0x4c   : > { %p2023_p2 = scmp.ne.s32.totalorder %s206_s27, %s2022_s1  ;;  %p2031_p12 = scmp.lt.s32.totalorder %s2022_s1, %s2022_s1 }
  0x4e   : > { %p2025_p10 = pnand %p2023_p2, %p2011_p3  ;;  %p2032_p4 = por %p2031_p12, %p2030_p7 }
  0x50   : > { %p2026_p8 = pneg %p2025_p10 }
  0x52   : > { %p2033_p6 = pnand %p2032_p4, %p2026_p8 }
  0x54   : > { %2036 = shalt.err (!%p2033_p6)
}
  0x55   : > { %s2767_s8 = smov 4   ;;  %s2768_s11 = smov 64  }
  0x56   : > { %1845 = dma.hbm_to_vmem [thread:$0]  (!%p2298_p1), %s2766_s0, 1024, %s206_s27, [#allocation5], %s2768_s11, %s2768_s11, %s2767_s8  }
  0x57   : > { %p2769_p2 = scmp.ne.s32.totalorder %s2765_s5, 0  ;;  %s1515_s1 = sshll.u32 %s247_s7, 7 }
  0x58   : > { %s1588_s9 = sshll.u32 %s2153_s19, 11  ;;  %s249_s14 = scalar_lea.vmem [#allocation9], %s1515_s1 }
  0x59   : > { %s2787_s30 = smov (%p2769_p2, %s40_s30), 0  ;;  %s2338_s20 = scalar_lea.hbm %s2736_s2, %s1588_s9 }
  0x5a   : > { %s108_s10 = ssub.s32 %s2153_s19, %s2787_s30  ;;  %s256_s26 = sshll.u32 %s249_s14, 4  ;;  %s2343_s26 = int_to_ptr.vmem [resolvable:$true] %s256_s26 }
  0x5b   : > { %p109_p7 = scmp.eq.s32.totalorder %s108_s10, 0  ;;  %s2037_s5 = scalar_lea.hbm %s2338_s20, 2048 }
  0x5c   : > { %p2038_p8 = scmp.ne.s32.totalorder %s2338_s20, %s2037_s5  ;;  %p2770_p10 = scmp.ne.s32.totalorder %s2763_s28, 0 }
  0x5d   : > { %s2341_s27 = scalar_select %p109_p7, %s2145_s17, %s111_s6  }
  0x5e   : > { %p2039_p12 = pneg %p2770_p10  ;;  %s2042_s10 = scalar_lea.hbm %s2736_s2, 4096 }
  0x5f   : > { %p2043_p6 = scmp.lt.u32.totalorder %s2338_s20, %s2736_s2  ;;  %p2044_p5 = scmp.lt.u32.totalorder %s2042_s10, %s2037_s5 }
  0x60   : > { %p2040_p4 = pnand %p2039_p12, %p2038_p8  ;;  %p2046_p9 = scmp.lt.u32.totalorder %s2037_s5, %s2338_s20 }
  0x61   : > { %p2045_p3 = por %p2044_p5, %p2043_p6 }
  0x62   : > { %p2041_p1 = pneg %p2040_p4 }
  0x63   : > { %p2047_p11 = por %p2046_p9, %p2045_p3 }
  0x65   : > { %p2048_p13 = pnand %p2047_p11, %p2041_p1 }
  0x67   : > { %2051 = shalt.err (!%p2048_p13)
}
  0x68   : > { %s2052_s6 = scalar_lea.vmem %s2343_s26, 2048  ;;  %s2163_s1 = smov [#allocation9]  }
  0x69   : > { %p2053_p0 = scmp.ne.s32.totalorder %s2343_s26, %s2052_s6  ;;  %s2057_s14 = sshll.u32 %s2163_s1, 4  ;;  %s2058_s14 = int_to_ptr.vmem [resolvable:$false] %s2057_s14 }
  0x6a   : > { %s2059_s7 = scalar_lea.vmem %s2058_s14, 4096  ;;  %p2060_p8 = scmp.lt.s32.totalorder %s2343_s26, %s2058_s14 }
  0x6b   : > { %p2055_p2 = pnand %p2053_p0, %p2039_p12  ;;  %p2061_p4 = scmp.lt.s32.totalorder %s2059_s7, %s2052_s6 }
  0x6d   : > { %p2056_p7 = pneg %p2055_p2  ;;  %p2062_p6 = por %p2061_p4, %p2060_p8 }
  0x6f   : > { %p2063_p5 = pnand %p2062_p6, %p2056_p7 }
  0x71   : > { %2066 = shalt.err (!%p2063_p5)
}
  0x72   : > { %1852 = dma.hbm_to_vmem [thread:$0]  (!%p2770_p10), %s2338_s20, 2048, %s2343_s26, %s2234_s25, %s2768_s11, %s2768_s11, %s2767_s8  }
  0x73   : > { %p2771_p12 = scmp.ne.s32.totalorder %s2761_s24, 0 }
  0x74   : > { %p2772_p1 = scmp.eq.s32.totalorder (!%p2771_p12), %s2257_s13, 0 }
  0x75   : > { %274 = sbr.rel (%p2771_p12) target bundleno = 845 (0x34d), region = 36 }
  0x7c   : > { %2120 = dma.done.wait (%p2772_p1), [#allocation5], 1024   ;;  %p2773_p3 = pmov %p2772_p1 }
  0x7d   : > { %s280_s5 = sand.u32 1, %s2257_s13   ;;  %p2774_p9 = pmov %p2772_p1 }
  0x7e   : > { %2122 = vsyncadd (%p2773_p3), [#allocation5], 4294966272  ;;  %s281_s28 = scalar_lea.sflag [#allocation8], %s280_s5 }
  0x7f   : > { %2124 = dma.done.wait (%p2774_p9), %s281_s28, 1024   ;;  %p2775_p11 = pmov %p2772_p1 }
  0x80   : > { %s2386_s20 = sand.u32 1, %s2141_s16   ;;  %p2776_p10 = scmp.ne.s32.totalorder %s2758_s21, 0 }
  0x81   : > { %2126 = vsyncadd (%p2775_p11), %s281_s28, 4294966272  ;;  %s1521_s25 = sshll.u32 %s2386_s20, 7 }
  0x82   : > { %s2389_s24 = scalar_lea.vmem [#allocation9], %s1521_s25 }
  0x83   : > { %2128 = dma.done.wait (%p2776_p10), %s281_s28, 2048  }
  0x84   : > { %2130 = vsyncadd (%p2776_p10), %s281_s28, 4294965248  ;;  %s1522_s13 = sshll.u32 %s2386_s20, 6  ;;  %p333_p13 = scmp.lt.s32.totalorder %s2149_s18, 1 }
  0x85   : > { %p338_p0 = scmp.lt.s32.totalorder %s2149_s18, 0  ;;  %s339_s11 = ssub.s32 0, %s2149_s18 }
  0x86   : > { %s2399_s8 = scalar_select %p333_p13, %s2149_s18, 1 }
  0x87   : > { %s344_s26 = sadd.s32 1, %s2149_s18  ;;  %s1523_s29 = smin.u32 %s2149_s18, %s339_s11 }
  0x88   : > { %s335_s21 = scalar_lea.vmem %s2737_s3, %s2399_s8  ;;  %s341_s12 = sand.u32 1, %s1523_s29  }
  0x89   : > { %p345_p2 = scmp.lt.s32.totalorder %s344_s26, 0  ;;  %s342_s6 = ssub.s32 0, %s341_s12 }
  0x8a   : > { %s346_s1 = ssub.s32 0, %s344_s26  ;;  %s2789_s6 = smov (!%p338_p0, %s342_s6), %s341_s12 }
  0x8b   : > { %s1524_s14 = smin.u32 %s346_s1, %s344_s26  ;;  %p353_p7 = scmp.eq.s32.totalorder %s2149_s18, 0 }
  0x8c   : > { %s348_s7 = sand.u32 1, %s1524_s14   ;;  %s1525_s5 = sshll.u32 %s2789_s6, 7  ;;  %v1917_v0 = vld [vmem:[#allocation7] sm:$0xff] (%p353_p7)   ;;  %v1918_v1 = vld [vmem:[#allocation7 + $0x8] sm:$0xff] (%p353_p7)   ;;  %v1919_v2 = vld [vmem:[#allocation7 + $0x10] sm:$0xff] (%p353_p7)  }
  0x8d   : > { %s349_s28 = ssub.s32 0, %s348_s7  ;;  %s2412_s0 = scalar_lea.vmem [#allocation10], %s1522_s13  ;;  %428 = vst [vmem:[#allocation2] sm:$0xff] (%p353_p7), %v1917_v0  ;;  %429 = vst [vmem:[#allocation2 + $0x8] sm:$0xff] (%p353_p7), %v1918_v1  ;;  %v1920_v3 = vld [vmem:[#allocation7 + $0x18] sm:$0xff] (%p353_p7)   ;;  %v1921_v4 = vld [vmem:[#allocation7 + $0x20] sm:$0xff] (%p353_p7)  }
  0x8e   : > { %s2791_s28 = smov (!%p345_p2, %s349_s28), %s348_s7  ;;  %358 = sbr.rel (!%p353_p7) target bundleno = 149 (0x95), region = 52 }
  0x8f   : > { %s1526_s25 = sshll.u32 %s2791_s28, 7  ;;  %430 = vst [vmem:[#allocation2 + $0x10] sm:$0xff] (%p353_p7), %v1919_v2  ;;  %431 = vst [vmem:[#allocation2 + $0x18] sm:$0xff] (%p353_p7), %v1920_v3  ;;  %v1922_v5 = vld [vmem:[#allocation7 + $0x28] sm:$0xff] (%p353_p7)   ;;  %v1923_v6 = vld [vmem:[#allocation7 + $0x30] sm:$0xff] (%p353_p7)  }
  0x90   : > { %432 = vst [vmem:[#allocation2 + $0x20] sm:$0xff] (%p353_p7), %v1921_v4  ;;  %433 = vst [vmem:[#allocation2 + $0x28] sm:$0xff] (%p353_p7), %v1922_v5  ;;  %v1924_v7 = vld [vmem:[#allocation7 + $0x38] sm:$0xff] (%p353_p7)  }
  0x91   : > { %434 = vst [vmem:[#allocation2 + $0x30] sm:$0xff] (%p353_p7), %v1923_v6  ;;  %435 = vst [vmem:[#allocation2 + $0x38] sm:$0xff] (%p353_p7), %v1924_v7 }
  0x95 PF: > { %s458_s13 = sshra.s32 %s1525_s5, 4  ;;  %v1925_v8 = vld [vmem:[#allocation4] sm:$0xff]   ;;  %v1936_v14 = vld [vmem:[%s2389_s24 + $0x48] sm:$0xff]   ;;  %v1938_v16 = vld [vmem:[%s2389_s24 + $0x50] sm:$0xff]   ;;  %s2546_s10 = sshra.s32 %s1526_s25, 4 }
  0x96   : > { %s1536_s11 = sshll.u32 %s458_s13, 3  ;;  %1718 = vmatprep.mubr.bf16.mxu0 %v1925_v8  ;;  %v1934_v13 = vld [vmem:[%s2389_s24 + $0x40] sm:$0xff]   ;;  %v1940_v18 = vld [vmem:[%s2389_s24 + $0x58] sm:$0xff]   ;;  %v1944_v22 = vld [vmem:[%s2389_s24 + $0x68] sm:$0xff]   ;;  %s1563_s8 = sshll.u32 %s2546_s10, 3 }
  0x97   : > { %s2414_s26 = scalar_lea.vmem [#allocation2], %s1536_s11  ;;  %1734 = vmatprep.subr.bf16.mxu1 %v1934_v13  ;;  %v1942_v20 = vld [vmem:[%s2389_s24 + $0x60] sm:$0xff]   ;;  %v1926_v24 = vld [vmem:[#allocation4 + $0x8] sm:$0xff]   ;;  %v1927_v25 = vld [vmem:[#allocation4 + $0x10] sm:$0xff]   ;;  %s1606_s29 = sshll.u32 %s2149_s18, 10 }
  0x98   : > { %v2417_v9 = vld [vmem:[%s2414_s26] sm:$0xff]  ;;  %v2420_v10 = vld [vmem:[%s2414_s26 + $0x8] sm:$0xff]  ;;  %v2426_v11 = vld [vmem:[%s2414_s26 + $0x10] sm:$0xff]  ;;  %1735 = vmatpush3.bf16.msra.mxu1 %v1934_v13  ;;  %s1366_s12 = sshll.u32 %s2412_s0, 4  ;;  %s2682_s14 = scalar_lea.hbm %s2738_s4, %s1606_s29  ;;  %s2684_s12 = int_to_ptr.vmem [resolvable:$true] %s1366_s12 }
  0x99   : > { %1702 = vmatprep.subr.bf16.mxu0 %v2417_v9  ;;  %v2431_v12 = vld [vmem:[%s2414_s26 + $0x18] sm:$0xff]  ;;  %v2438_v15 = vld [vmem:[%s2414_s26 + $0x20] sm:$0xff]  ;;  %1736 = vmatprep.subr.bf16.mxu1 %v1936_v14  ;;  %v2444_v17 = vld [vmem:[%s2414_s26 + $0x28] sm:$0xff]  ;;  %v746_v40 = vunpack.c.l.bf16 %v2420_v10  ;;  %v747_v41 = vunpack.c.h.bf16 %v2420_v10  ;;  %v744_v43 = vunpack.c.l.bf16 %v2417_v9  ;;  %v745_v44 = vunpack.c.h.bf16 %v2417_v9  ;;  %s1351_s18 = scalar_lea.sflag [#allocation6], %s2386_s20  ;;  %s2067_s7 = scalar_lea.vmem %s2684_s12, 1024 }
  0x9a   : > { %1703 = vmatpush3.bf16.msra.mxu0 %v2417_v9  ;;  %v2450_v19 = vld [vmem:[%s2414_s26 + $0x30] sm:$0xff]  ;;  %v2456_v21 = vld [vmem:[%s2414_s26 + $0x38] sm:$0xff]  ;;  %v2462_v23 = vld [vmem:[%s2389_s24] sm:$0xff]   ;;  %v750_v56 = vunpack.c.l.bf16 %v2431_v12  ;;  %v751_v57 = vunpack.c.h.bf16 %v2431_v12  ;;  %v748_v59 = vunpack.c.l.bf16 %v2426_v11  ;;  %v749_v60 = vunpack.c.h.bf16 %v2426_v11  ;;  %p2068_p8 = scmp.ne.s32.totalorder %s2684_s12, %s2067_s7  ;;  %p2777_p4 = scmp.ne.s32.totalorder %s2759_s22, 0 }
  0x9b   : > { %1704 = vmatprep.subr.bf16.mxu0 %v2420_v10  ;;  %v2467_v26 = vld [vmem:[%s2389_s24 + $0x8] sm:$0xff]   ;;  %v2472_v27 = vld [vmem:[%s2389_s24 + $0x10] sm:$0xff]   ;;  %v1928_v28 = vld [vmem:[#allocation4 + $0x18] sm:$0xff]   ;;  %v754_v8 = vunpack.c.l.bf16 %v2444_v17  ;;  %v755_v9 = vunpack.c.h.bf16 %v2444_v17  ;;  %s2164_s5 = smov [#allocation10]  }
  0x9c   : > { %1737 = vmatpush3.bf16.msra.mxu1 %v1936_v14  ;;  %v1929_v29 = vld [vmem:[#allocation4 + $0x20] sm:$0xff]   ;;  %v2477_v30 = vld [vmem:[%s2389_s24 + $0x18] sm:$0xff]   ;;  %v1930_v32 = vld [vmem:[#allocation4 + $0x28] sm:$0xff]   ;;  %p2069_p6 = pnand %p2068_p8, %p2777_p4  ;;  %s2071_s28 = sshll.u32 %s2164_s5, 4  ;;  %s2072_s28 = int_to_ptr.vmem [resolvable:$false] %s2071_s28 }
  0x9d   : > { %1738 = vmatprep.subr.bf16.mxu1 %v1938_v16  ;;  %v2482_v31 = vld [vmem:[%s2389_s24 + $0x20] sm:$0xff]   ;;  %v1931_v33 = vld [vmem:[#allocation4 + $0x30] sm:$0xff]   ;;  %v2487_v34 = vld [vmem:[%s2389_s24 + $0x28] sm:$0xff]   ;;  %s2073_s25 = scalar_lea.vmem %s2072_s28, 2048  ;;  %p2074_p12 = scmp.lt.s32.totalorder %s2684_s12, %s2072_s28 }
  0x9e   : > { %1705 = vmatpush3.bf16.msra.mxu0 %v2420_v10  ;;  %v2492_v35 = vld [vmem:[%s2389_s24 + $0x30] sm:$0xff]   ;;  %v1932_v36 = vld [vmem:[#allocation4 + $0x38] sm:$0xff]   ;;  %p2070_p5 = pneg %p2069_p6  ;;  %p2075_p1 = scmp.lt.s32.totalorder %s2073_s25, %s2067_s7 }
  0x9f   : > { %1706 = vmatprep.subr.bf16.mxu0 %v2426_v11  ;;  %v1946_v37 = vld [vmem:[%s2389_s24 + $0x70] sm:$0xff]   ;;  %v2499_v38 = vld [vmem:[%s2389_s24 + $0x38] sm:$0xff]  }
  0xa0   : > { %1739 = vmatpush3.bf16.msra.mxu1 %v1938_v16  ;;  %v1948_v39 = vld [vmem:[%s2389_s24 + $0x78] sm:$0xff]   ;;  %p2076_p3 = por %p2075_p1, %p2074_p12 }
  0xa1   : > { %1740 = vmatprep.subr.bf16.mxu1 %v1940_v18 }
  0xa2   : > { %1707 = vmatpush3.bf16.msra.mxu0 %v2426_v11  ;;  %v752_v11 = vunpack.c.l.bf16 %v2438_v15  ;;  %p2077_p9 = pnand %p2076_p3, %p2070_p5 }
  0xa3   : > { %1708 = vmatprep.subr.bf16.mxu0 %v2431_v12 }
  0xa4   : > { %1741 = vmatpush3.bf16.msra.mxu1 %v1940_v18 }
  0xa5   : > { %1742 = vmatprep.subr.bf16.mxu1 %v1942_v20 }
  0xa6   : > { %1709 = vmatpush3.bf16.msra.mxu0 %v2431_v12  ;;  %v753_v12 = vunpack.c.h.bf16 %v2438_v15 }
  0xa7   : > { %1710 = vmatprep.subr.bf16.mxu0 %v2438_v15 }
  0xa8   : > { %1743 = vmatpush3.bf16.msra.mxu1 %v1942_v20 }
  0xa9   : > { %1744 = vmatprep.subr.bf16.mxu1 %v1944_v22 }
  0xaa   : > { %1711 = vmatpush3.bf16.msra.mxu0 %v2438_v15  ;;  %v758_v15 = vunpack.c.l.bf16 %v2456_v21 }
  0xab   : > { %1712 = vmatprep.subr.bf16.mxu0 %v2444_v17 }
  0xac   : > { %1745 = vmatpush3.bf16.msra.mxu1 %v1944_v22 }
  0xad   : > { %1746 = vmatprep.subr.bf16.mxu1 %v1946_v37 }
  0xae   : > { %1713 = vmatpush3.bf16.msra.mxu0 %v2444_v17 }
  0xaf   : > { %1714 = vmatprep.subr.bf16.mxu0 %v2450_v19 }
  0xb0   : > { %1747 = vmatpush3.bf16.msra.mxu1 %v1946_v37 }
  0xb1   : > { %1748 = vmatprep.subr.bf16.mxu1 %v1948_v39 }
  0xb2   : > { %1715 = vmatpush3.bf16.msra.mxu0 %v2450_v19 }
  0xb3   : > { %1716 = vmatprep.subr.bf16.mxu0 %v2456_v21 }
  0xb4   : > { %1749 = vmatpush3.bf16.msra.mxu1 %v1948_v39 }
  0xb5   : > { %1798 = vmatprep.subr.bf16.mxu1 %v2462_v23 }
  0xb6   : > { %1717 = vmatpush3.bf16.msra.mxu0 %v2456_v21 }
  0xb7   : > { %1766 = vmatprep.subr.bf16.mxu0 %v2462_v23 }
  0xb9   : > { %1719 = vmatmul.mubr.bf16.vlgmr.msra.gmra.mrb[0].mxu0 %v1926_v24 }
  0xba   : > { %1722 = vmatprep.mubr.bf16.mxu0 %v1927_v25  ;;  %1767 = vmatpush3.bf16.msra.mxu0 %v2462_v23 }
  0xbb   : > { %1768 = vmatprep.subr.bf16.mxu0 %v2467_v26 }
  0xbe   : > { %1769 = vmatpush3.bf16.msra.mxu0 %v2467_v26 }
  0xbf   : > { %1770 = vmatprep.subr.bf16.mxu0 %v2472_v27 }
  0xc1   : > { %1723 = vmatmul.mubr.bf16.gmra.mrb[4].mxu0 %v1928_v28 }
  0xc2   : > { %1726 = vmatprep.mubr.bf16.mxu0 %v1929_v29  ;;  %1771 = vmatpush3.bf16.msra.mxu0 %v2472_v27  ;;  %v756_v29 = vunpack.c.l.bf16 %v2450_v19 }
  0xc3   : > { %1772 = vmatprep.subr.bf16.mxu0 %v2477_v30 }
  0xc6   : > { %1773 = vmatpush3.bf16.msra.mxu0 %v2477_v30 }
  0xc7   : > { %1774 = vmatprep.subr.bf16.mxu0 %v2482_v31 }
  0xc9   : > { %1727 = vmatmul.mubr.bf16.gmra.mrb[8].mxu0 %v1930_v32  ;;  %v757_v32 = vunpack.c.h.bf16 %v2450_v19 }
  0xca   : > { %1730 = vmatprep.mubr.bf16.mxu0 %v1931_v33  ;;  %1775 = vmatpush3.bf16.msra.mxu0 %v2482_v31 }
  0xcb   : > { %1776 = vmatprep.subr.bf16.mxu0 %v2487_v34 }
  0xce   : > { %1777 = vmatpush3.bf16.msra.mxu0 %v2487_v34 }
  0xcf   : > { %1778 = vmatprep.subr.bf16.mxu0 %v2492_v35 }
  0xd1   : > { %1731 = vmatmul.mubr.bf16.gmra.mrb[12].mxu0 %v1932_v36 }
  0xd2   : > { %1779 = vmatpush3.bf16.msra.mxu0 %v2492_v35 }
  0xd3   : > { %1780 = vmatprep.subr.bf16.mxu0 %v2499_v38 }
  0xd6   : > { %1781 = vmatpush3.bf16.msra.mxu0 %v2499_v38 }
 0x18c   : > { %v1720_v42 = vpop.f32.mrb[0].mxu0 }
 0x18d   : > { %v584_v45 = vpop.f32.mrb[1].mxu0  ;;  %v762_v47 = vmul.f32 %v1720_v42, %v746_v40 }
 0x18e   : > { %v1721_v46 = vpop.f32.mrb[2].mxu0  ;;  %v760_v51 = vmul.f32 %v744_v43, %v584_v45 }
 0x18f   : > { %v763_v48 = vmul.f32 %v1721_v46, %v747_v41  ;;  %v785_v49 = vpack.c.bf16 %v1721_v46, %v1720_v42  ;;  %v587_v50 = vpop.f32.mrb[3].mxu0 }
 0x190   : > { %v761_v52 = vmul.f32 %v745_v44, %v587_v50  ;;  %v784_v53 = vpack.c.bf16 %v587_v50, %v584_v45 }
 0x191   : > { %v777_v54 = vpack.c.bf16 %v763_v48, %v762_v47 }
 0x192   : > { %1782 = vmatprep.mubr.bf16.mxu0 %v784_v53  ;;  %v776_v55 = vpack.c.bf16 %v761_v52, %v760_v51 }
 0x193   : > { %1783 = vmatmul.mubr.bf16.vlgmr.msra.gmra.mrb[16].mxu0 %v785_v49 }
 0x194   : > { %v1724_v58 = vpop.f32.mrb[4].mxu0  ;;  %1750 = vmatprep.mubr.bf16.mxu1 %v776_v55 }
 0x195   : > { %v600_v61 = vpop.f32.mrb[5].mxu0  ;;  %1751 = vmatmul.mubr.bf16.vlgmr.msra.gmra.mrb[0].mxu1 %v777_v54  ;;  %v766_v63 = vmul.f32 %v1724_v58, %v750_v56 }
 0x196   : > { %1806 = vmatpush3.bf16.msra.mxu1 %v2462_v23  ;;  %v1725_v62 = vpop.f32.mrb[6].mxu0  ;;  %v764_v3 = vmul.f32 %v748_v59, %v600_v61 }
 0x197   : > { %v767_v0 = vmul.f32 %v1725_v62, %v751_v57  ;;  %v787_v1 = vpack.c.bf16 %v1725_v62, %v1724_v58  ;;  %v603_v2 = vpop.f32.mrb[7].mxu0  ;;  %1799 = vmatprep.subr.bf16.mxu1 %v2467_v26 }
 0x198   : > { %v765_v4 = vmul.f32 %v749_v60, %v603_v2  ;;  %v786_v5 = vpack.c.bf16 %v603_v2, %v600_v61 }
 0x199   : > { %v779_v6 = vpack.c.bf16 %v767_v0, %v766_v63 }
 0x19a   : > { %v778_v7 = vpack.c.bf16 %v765_v4, %v764_v3  ;;  %1807 = vmatpush3.bf16.msra.mxu1 %v2467_v26  ;;  %1786 = vmatprep.mubr.bf16.mxu0 %v786_v5 }
 0x19b   : > { %1787 = vmatmul.mubr.bf16.gmra.mrb[20].mxu0 %v787_v1  ;;  %1800 = vmatprep.subr.bf16.mxu1 %v2472_v27 }
 0x19c   : > { %v1728_v10 = vpop.f32.mrb[8].mxu0  ;;  %1754 = vmatprep.mubr.bf16.mxu1 %v778_v7 }
 0x19d   : > { %v616_v13 = vpop.f32.mrb[9].mxu0  ;;  %1755 = vmatmul.mubr.bf16.gmra.mrb[4].mxu1 %v779_v6  ;;  %v770_v16 = vmul.f32 %v1728_v10, %v754_v8 }
 0x19e   : > { %1808 = vmatpush3.bf16.msra.mxu1 %v2472_v27  ;;  %v1729_v14 = vpop.f32.mrb[10].mxu0  ;;  %v768_v23 = vmul.f32 %v752_v11, %v616_v13  ;;  %v759_v27 = vunpack.c.h.bf16 %v2456_v21 }
 0x19f   : > { %v771_v18 = vmul.f32 %v1729_v14, %v755_v9  ;;  %v789_v20 = vpack.c.bf16 %v1729_v14, %v1728_v10  ;;  %v619_v22 = vpop.f32.mrb[11].mxu0  ;;  %1801 = vmatprep.subr.bf16.mxu1 %v2477_v30 }
 0x1a0   : > { %v769_v24 = vmul.f32 %v753_v12, %v619_v22  ;;  %v788_v17 = vpack.c.bf16 %v619_v22, %v616_v13 }
 0x1a1   : > { %v781_v25 = vpack.c.bf16 %v771_v18, %v770_v16 }
 0x1a2   : > { %v780_v26 = vpack.c.bf16 %v769_v24, %v768_v23  ;;  %1809 = vmatpush3.bf16.msra.mxu1 %v2477_v30 }
 0x1a3   : > { %1802 = vmatprep.subr.bf16.mxu1 %v2482_v31 }
 0x1a4   : > { %v1732_v28 = vpop.f32.mrb[12].mxu0  ;;  %1758 = vmatprep.mubr.bf16.mxu1 %v780_v26 }
 0x1a5   : > { %v632_v33 = vpop.f32.mrb[13].mxu0  ;;  %1759 = vmatmul.mubr.bf16.gmra.mrb[8].mxu1 %v781_v25  ;;  %v774_v37 = vmul.f32 %v1732_v28, %v758_v15 }
 0x1a6   : > { %1810 = vmatpush3.bf16.msra.mxu1 %v2482_v31  ;;  %v1733_v36 = vpop.f32.mrb[14].mxu0  ;;  %v772_v41 = vmul.f32 %v756_v29, %v632_v33 }
 0x1a7   : > { %v775_v39 = vmul.f32 %v1733_v36, %v759_v27  ;;  %v791_v30 = vpack.c.bf16 %v1733_v36, %v1732_v28  ;;  %v635_v40 = vpop.f32.mrb[15].mxu0  ;;  %1803 = vmatprep.subr.bf16.mxu1 %v2487_v34 }
 0x1a8   : > { %v773_v42 = vmul.f32 %v757_v32, %v635_v40  ;;  %v790_v21 = vpack.c.bf16 %v635_v40, %v632_v33 }
 0x1a9   : > { %v783_v43 = vpack.c.bf16 %v775_v39, %v774_v37 }
 0x1aa   : > { %v782_v44 = vpack.c.bf16 %v773_v42, %v772_v41  ;;  %1811 = vmatpush3.bf16.msra.mxu1 %v2487_v34  ;;  %v2541_v34 = vld [vmem:[%s335_s21] ss:$0 sm:$0xff]  ;;  %s2572_s21 = scalar_lea.vmem [#allocation2], %s1563_s8 }
 0x1ab   : > { %1804 = vmatprep.subr.bf16.mxu1 %v2492_v35 }
 0x1ac   : > { %1762 = vmatprep.mubr.bf16.mxu1 %v782_v44 }
 0x1ad   : > { %1763 = vmatmul.mubr.bf16.gmra.mrb[12].mxu1 %v783_v43 }
 0x1ae   : > { %1812 = vmatpush3.bf16.msra.mxu1 %v2492_v35  ;;  %1790 = vmatprep.mubr.bf16.mxu1 %v788_v17 }
 0x1af   : > { %1805 = vmatprep.subr.bf16.mxu1 %v2499_v38 }
 0x1b2   : > { %1813 = vmatpush3.bf16.msra.mxu1 %v2499_v38 }
 0x1b5   : > { %1791 = vmatmul.mubr.bf16.vlgmr.msra.gmra.mrb[8].mxu1 %v789_v20 }
 0x1b6   : > { %1794 = vmatprep.mubr.bf16.mxu1 %v790_v21 }
 0x1bd   : > { %1795 = vmatmul.mubr.bf16.gmra.mrb[12].mxu1 %v791_v30 }
 0x266   : > { %v1784_v19 = vpop.f32.mrb[16].mxu0 }
 0x267   : > { %v1019_v31 = vpop.f32.mrb[17].mxu0 }
 0x268   : > { %v1752_v45 = vpop.f32.mrb[0].mxu1  ;;  %v1785_v46 = vpop.f32.mrb[18].mxu0 }
 0x269   : > { %v1028_v35 = vadd.f32 %v1784_v19, %v1752_v45  ;;  %v874_v47 = vpop.f32.mrb[1].mxu1  ;;  %v1022_v48 = vpop.f32.mrb[19].mxu0 }
 0x26a   : > { %v1020_v49 = vadd.f32 %v1019_v31, %v874_v47  ;;  %v1753_v50 = vpop.f32.mrb[2].mxu1 }
 0x26b   : > { %v1091_v38 = vadd.f32 %v2541_v34, %v1028_v35  ;;  %v1031_v51 = vadd.f32 %v1785_v46, %v1753_v50  ;;  %v877_v52 = vpop.f32.mrb[3].mxu1 }
 0x26c   : > { %v1089_v53 = vadd.f32 %v2541_v34, %v1020_v49  ;;  %v1023_v54 = vadd.f32 %v1022_v48, %v877_v52 }
 0x26d   : > { %v1092_v55 = vadd.f32 %v2541_v34, %v1031_v51  ;;  %vm1107_vm0 = vcmp.ge.f32.partialorder %v1091_v38, 0.0  ;;  %v1123_v56 = vmul.f32 0.2, %v1091_v38 }
 0x26e   : > { %v1090_v57 = vadd.f32 %v2541_v34, %v1023_v54  ;;  %v1788_v58 = vpop.f32.mrb[20].mxu0  ;;  %vm1105_vm1 = vcmp.ge.f32.partialorder %v1089_v53, 0.0  ;;  %v1121_v59 = vmul.f32 0.2, %v1089_v53 }
 0x26f   : > { %v1124_v60 = vmul.f32 0.2, %v1092_v55  ;;  %v1035_v61 = vpop.f32.mrb[21].mxu0  ;;  %v2552_v62 = vsel %vm1107_vm0, %v1091_v38, %v1123_v56  ;;  %vm1108_vm2 = vcmp.ge.f32.partialorder %v1092_v55, 0.0 }
 0x270   : > { %v1122_v63 = vmul.f32 0.2, %v1090_v57  ;;  %v1756_v0 = vpop.f32.mrb[4].mxu1  ;;  %v1789_v1 = vpop.f32.mrb[22].mxu0  ;;  %v1176_v2 = vmul.f32 %v2552_v62, %v2552_v62  ;;  %v2556_v3 = vsel %vm1105_vm1, %v1089_v53, %v1121_v59  ;;  %vm1106_vm3 = vcmp.ge.f32.partialorder %v1090_v57, 0.0 }
 0x271   : > { %v1044_v4 = vadd.f32 %v1788_v58, %v1756_v0  ;;  %v890_v5 = vpop.f32.mrb[5].mxu1  ;;  %v1038_v6 = vpop.f32.mrb[23].mxu0  ;;  %v1174_v7 = vmul.f32 %v2556_v3, %v2556_v3  ;;  %v2560_v8 = vsel %vm1108_vm2, %v1092_v55, %v1124_v60 }
 0x272   : > { %v1036_v9 = vadd.f32 %v1035_v61, %v890_v5  ;;  %v1757_v10 = vpop.f32.mrb[6].mxu1  ;;  %1194 = vadd.xlane.f32.xlu1 %v1176_v2  ;;  %v1154_v11 = vpack.c.bf16 %v2560_v8, %v2552_v62  ;;  %v2564_v12 = vsel %vm1106_vm3, %v1090_v57, %v1122_v63  ;;  %v1177_v23 = vmul.f32 %v2560_v8, %v2560_v8 }
 0x273   : > { %v1095_v13 = vadd.f32 %v2541_v34, %v1044_v4  ;;  %v1047_v14 = vadd.f32 %v1789_v1, %v1757_v10  ;;  %v893_v16 = vpop.f32.mrb[7].mxu1  ;;  %1190 = vadd.xlane.f32.xlu0 %v1174_v7  ;;  %v1153_v18 = vpack.c.bf16 %v2564_v12, %v2556_v3  ;;  %v1175_v25 = vmul.f32 %v2564_v12, %v2564_v12 }
 0x274   : > { %v1093_v20 = vadd.f32 %v2541_v34, %v1036_v9  ;;  %v1039_v22 = vadd.f32 %v1038_v6, %v893_v16  ;;  %1167 = vst [vmem:[%s2572_s21 + $0x8] sm:$0xff] %v1154_v11 }
 0x275   : > { %v1127_v24 = vmul.f32 0.2, %v1095_v13  ;;  %v1096_v17 = vadd.f32 %v2541_v34, %v1047_v14  ;;  %1166 = vst [vmem:[%s2572_s21] sm:$0xff] %v1153_v18  ;;  %vm1111_vm4 = vcmp.ge.f32.partialorder %v1095_v13, 0.0 }
 0x276   : > { %v1125_v26 = vmul.f32 0.2, %v1093_v20  ;;  %v1094_v15 = vadd.f32 %v2541_v34, %v1039_v22  ;;  %1196 = vadd.xlane.f32.xlu1 %v1177_v23  ;;  %vm1109_vm6 = vcmp.ge.f32.partialorder %v1093_v20, 0.0 }
 0x277   : > { %v1128_v27 = vmul.f32 0.2, %v1096_v17  ;;  %1192 = vadd.xlane.f32.xlu0 %v1175_v25  ;;  %v2580_v28 = vsel %vm1111_vm4, %v1095_v13, %v1127_v24  ;;  %vm1112_vm5 = vcmp.ge.f32.partialorder %v1096_v17, 0.0 }
 0x278   : > { %v1126_v29 = vmul.f32 0.2, %v1094_v15  ;;  %v1180_v32 = vmul.f32 %v2580_v28, %v2580_v28  ;;  %vm1110_vm7 = vcmp.ge.f32.partialorder %v1094_v15, 0.0  ;;  %v2590_v39 = vsel %vm1109_vm6, %v1093_v20, %v1125_v26 }
 0x279   : > { %v2584_v33 = vsel %vm1112_vm5, %v1096_v17, %v1128_v27  ;;  %v1178_v41 = vmul.f32 %v2590_v39, %v2590_v39 }
 0x27a   : > { %v1181_v36 = vmul.f32 %v2584_v33, %v2584_v33  ;;  %v1156_v37 = vpack.c.bf16 %v2584_v33, %v2580_v28  ;;  %v2592_v30 = vsel %vm1110_vm7, %v1094_v15, %v1126_v29 }
 0x27b   : > { %1202 = vadd.xlane.f32.xlu0 %v1180_v32  ;;  %v1155_v40 = vpack.c.bf16 %v2592_v30, %v2590_v39  ;;  %v1179_v42 = vmul.f32 %v2592_v30, %v2592_v30 }
 0x27c   : > { %1204 = vadd.xlane.f32.xlu1 %v1181_v36  ;;  %1169 = vst [vmem:[%s2572_s21 + $0x18] sm:$0xff] %v1156_v37 }
 0x27d   : > { %1168 = vst [vmem:[%s2572_s21 + $0x10] sm:$0xff] %v1155_v40 }
 0x27f   : > { %1198 = vadd.xlane.f32.xlu0 %v1178_v41 }
 0x280   : > { %1200 = vadd.xlane.f32.xlu1 %v1179_v42 }
 0x288   : > { %v1792_v21 = vpop.f32.mrb[8].mxu1 }
 0x289   : > { %v1099_v43 = vadd.f32 %v1792_v21, %v2541_v34  ;;  %v1051_v44 = vpop.f32.mrb[9].mxu1 }
 0x28a   : > { %v1097_v19 = vadd.f32 %v2541_v34, %v1051_v44  ;;  %v1793_v31 = vpop.f32.mrb[10].mxu1 }
 0x28b   : > { %vm1115_vm8 = vcmp.ge.f32.partialorder %v1099_v43, 0.0  ;;  %v1131_v45 = vmul.f32 0.2, %v1099_v43  ;;  %v1100_v46 = vadd.f32 %v1793_v31, %v2541_v34  ;;  %v1054_v35 = vpop.f32.mrb[11].mxu1 }
 0x28c   : > { %vm1113_vm9 = vcmp.ge.f32.partialorder %v1097_v19, 0.0  ;;  %v1129_v47 = vmul.f32 0.2, %v1097_v19  ;;  %v1098_v48 = vadd.f32 %v2541_v34, %v1054_v35 }
 0x28d   : > { %vm1116_vm10 = vcmp.ge.f32.partialorder %v1100_v46, 0.0  ;;  %v1132_v49 = vmul.f32 0.2, %v1100_v46  ;;  %v2606_v50 = vsel %vm1115_vm8, %v1099_v43, %v1131_v45 }
 0x28e   : > { %vm1114_vm11 = vcmp.ge.f32.partialorder %v1098_v48, 0.0  ;;  %v1130_v38 = vmul.f32 0.2, %v1098_v48  ;;  %v1184_v51 = vmul.f32 %v2606_v50, %v2606_v50  ;;  %v2612_v53 = vsel %vm1113_vm9, %v1097_v19, %v1129_v47 }
 0x28f   : > { %v2610_v52 = vsel %vm1116_vm10, %v1100_v46, %v1132_v49  ;;  %v1182_v0 = vmul.f32 %v2612_v53, %v2612_v53 }
 0x290   : > { %1210 = vadd.xlane.f32.xlu0 %v1184_v51  ;;  %v1796_v54 = vpop.f32.mrb[12].mxu1  ;;  %v1185_v55 = vmul.f32 %v2610_v52, %v2610_v52  ;;  %v1158_v56 = vpack.c.bf16 %v2610_v52, %v2606_v50  ;;  %v2618_v57 = vsel %vm1114_vm11, %v1098_v48, %v1130_v38 }
 0x291   : > { %v1103_v58 = vadd.f32 %v1796_v54, %v2541_v34  ;;  %v1067_v59 = vpop.f32.mrb[13].mxu1  ;;  %v1157_v60 = vpack.c.bf16 %v2618_v57, %v2612_v53  ;;  %v1183_v5 = vmul.f32 %v2618_v57, %v2618_v57 }
 0x292   : > { %v1101_v61 = vadd.f32 %v2541_v34, %v1067_v59  ;;  %1212 = vadd.xlane.f32.xlu1 %v1185_v55  ;;  %1171 = vst [vmem:[%s2572_s21 + $0x28] sm:$0xff] %v1158_v56  ;;  %v1797_v63 = vpop.f32.mrb[14].mxu1 }
 0x293   : > { %v1135_v1 = vmul.f32 0.2, %v1103_v58  ;;  %v1104_v2 = vadd.f32 %v1797_v63, %v2541_v34  ;;  %v1070_v4 = vpop.f32.mrb[15].mxu1  ;;  %1170 = vst [vmem:[%s2572_s21 + $0x20] sm:$0xff] %v1157_v60  ;;  %vm1119_vm12 = vcmp.ge.f32.partialorder %v1103_v58, 0.0 }
 0x294   : > { %vm1117_vm13 = vcmp.ge.f32.partialorder %v1101_v61, 0.0  ;;  %v1133_v6 = vmul.f32 0.2, %v1101_v61  ;;  %v1102_v7 = vadd.f32 %v2541_v34, %v1070_v4  ;;  %1206 = vadd.xlane.f32.xlu0 %v1182_v0 }
 0x295   : > { %vm1120_vm14 = vcmp.ge.f32.partialorder %v1104_v2, 0.0  ;;  %v1136_v9 = vmul.f32 0.2, %v1104_v2  ;;  %v2636_v14 = vsel %vm1119_vm12, %v1103_v58, %v1135_v1 }
 0x296   : > { %vm1118_vm15 = vcmp.ge.f32.partialorder %v1102_v7, 0.0  ;;  %v1134_v10 = vmul.f32 0.2, %v1102_v7  ;;  %1208 = vadd.xlane.f32.xlu1 %v1183_v5  ;;  %v2632_v11 = vsel %vm1117_vm13, %v1101_v61, %v1133_v6  ;;  %v1188_v23 = vmul.f32 %v2636_v14, %v2636_v14 }
 0x297   : > { %v1186_v13 = vmul.f32 %v2632_v11, %v2632_v11  ;;  %v2638_v16 = vsel %vm1120_vm14, %v1104_v2, %v1136_v9 }
 0x298   : > { %v2640_v18 = vsel %vm1118_vm15, %v1102_v7, %v1134_v10  ;;  %v1160_v34 = vpack.c.bf16 %v2638_v16, %v2636_v14  ;;  %v1189_v24 = vmul.f32 %v2638_v16, %v2638_v16 }
 0x299   : > { %1214 = vadd.xlane.f32.xlu0 %v1186_v13  ;;  %v1187_v20 = vmul.f32 %v2640_v18, %v2640_v18  ;;  %v1159_v22 = vpack.c.bf16 %v2640_v18, %v2632_v11 }
 0x29a   : > { %1173 = vst [vmem:[%s2572_s21 + $0x38] sm:$0xff] %v1160_v34 }
 0x29b   : > { %1216 = vadd.xlane.f32.xlu1 %v1187_v20  ;;  %1172 = vst [vmem:[%s2572_s21 + $0x30] sm:$0xff] %v1159_v22 }
 0x29d   : > { %1218 = vadd.xlane.f32.xlu0 %v1188_v23 }
 0x29f   : > { %1220 = vadd.xlane.f32.xlu1 %v1189_v24 }
 0x2ff   : > { %v1195_v17 = vpop.xlane.xlu1 %1194 }
 0x300   : > { %v1224_v25 = vmax.f32 %v1195_v17, 1e-24  ;;  %v1191_v26 = vpop.xlane.xlu0 %1190 }
 0x301   : > { %v1222_v15 = vmax.f32 %v1191_v26, 1e-24 }
 0x302   : > { %1949 = vrsqrt.f32 %v1224_v25 }
 0x303   : > { %v1197_v27 = vpop.xlane.xlu1 %1196  ;;  %1951 = vrsqrt.f32 %v1222_v15 }
 0x304   : > { %v1225_v29 = vmax.f32 %v1197_v27, 1e-24  ;;  %v1193_v32 = vpop.xlane.xlu0 %1192 }
 0x305   : > { %v1223_v36 = vmax.f32 %v1193_v32, 1e-24 }
 0x306   : > { %1953 = vrsqrt.f32 %v1225_v29 }
 0x307   : > { %1955 = vrsqrt.f32 %v1223_v36 }
 0x308   : > { %v1203_v37 = vpop.xlane.xlu0 %1202 }
 0x309   : > { %v1228_v40 = vmax.f32 %v1203_v37, 1e-24  ;;  %v1205_v41 = vpop.xlane.xlu1 %1204 }
 0x30a   : > { %v1229_v42 = vmax.f32 %v1205_v41, 1e-24 }
 0x30b   : > { %1957 = vrsqrt.f32 %v1228_v40 }
 0x30c   : > { %1959 = vrsqrt.f32 %v1229_v42  ;;  %v1199_v21 = vpop.xlane.xlu0 %1198  ;;  %v1950_v19 = vpop.eup %1949 }
 0x30d   : > { %v1226_v43 = vmax.f32 %v1199_v21, 1e-24  ;;  %v1201_v44 = vpop.xlane.xlu1 %1200  ;;  %v1952_v45 = vpop.eup %1951  ;;  %v1256_v47 = vmul.f32 %v1950_v19, %v2552_v62 }
 0x30e   : > { %v1227_v31 = vmax.f32 %v1201_v44, 1e-24  ;;  %v1254_v49 = vmul.f32 %v1952_v45, %v2556_v3 }
 0x30f   : > { %1961 = vrsqrt.f32 %v1226_v43 }
 0x310   : > { %v1954_v46 = vpop.eup %1953  ;;  %1963 = vrsqrt.f32 %v1227_v31 }
 0x311   : > { %v1956_v35 = vpop.eup %1955  ;;  %v1257_v48 = vmul.f32 %v1954_v46, %v2560_v8 }
 0x312   : > { %v1255_v38 = vmul.f32 %v1956_v35, %v2564_v12 }
 0x313   : > { %v1615_v51 = vpack.c.bf16 %v1257_v48, %v1256_v47 }
 0x314   : > { %v1610_v54 = vpack.c.bf16 %v1255_v38, %v1254_v49 }
 0x315   : > { %v1958_v55 = vpop.eup %1957  ;;  %1647 = vst [vmem:[%s2412_s0 + $0x8] sm:$0xff] %v1615_v51  }
 0x316   : > { %v1960_v56 = vpop.eup %1959  ;;  %1611 = vst [vmem:[%s2412_s0] sm:$0xff] %v1610_v54   ;;  %v1260_v58 = vmul.f32 %v1958_v55, %v2580_v28 }
 0x317   : > { %v1261_v59 = vmul.f32 %v1960_v56, %v2584_v33 }
 0x319   : > { %v1962_v60 = vpop.eup %1961  ;;  %v1625_v62 = vpack.c.bf16 %v1261_v59, %v1260_v58 }
 0x31a   : > { %v1964_v61 = vpop.eup %1963  ;;  %v1258_v8 = vmul.f32 %v1962_v60, %v2590_v39 }
 0x31b   : > { %1649 = vst [vmem:[%s2412_s0 + $0x18] sm:$0xff] %v1625_v62   ;;  %v1259_v3 = vmul.f32 %v1964_v61, %v2592_v30 }
 0x31d   : > { %v1620_v12 = vpack.c.bf16 %v1259_v3, %v1258_v8  ;;  %v1211_v63 = vpop.xlane.xlu0 %1210 }
 0x31e   : > { %v1232_v0 = vmax.f32 %v1211_v63, 1e-24 }
 0x31f   : > { %1648 = vst [vmem:[%s2412_s0 + $0x10] sm:$0xff] %v1620_v12   ;;  %v1213_v1 = vpop.xlane.xlu1 %1212 }
 0x320   : > { %1965 = vrsqrt.f32 %v1232_v0  ;;  %v1233_v2 = vmax.f32 %v1213_v1, 1e-24 }
 0x321   : > { %v1207_v4 = vpop.xlane.xlu0 %1206 }
 0x322   : > { %1967 = vrsqrt.f32 %v1233_v2  ;;  %v1230_v28 = vmax.f32 %v1207_v4, 1e-24 }
 0x323   : > { %v1209_v5 = vpop.xlane.xlu1 %1208 }
 0x324   : > { %1969 = vrsqrt.f32 %v1230_v28  ;;  %v1231_v33 = vmax.f32 %v1209_v5, 1e-24 }
 0x326   : > { %1971 = vrsqrt.f32 %v1231_v33  ;;  %v1215_v6 = vpop.xlane.xlu0 %1214 }
 0x327   : > { %v1234_v7 = vmax.f32 %v1215_v6, 1e-24 }
 0x328   : > { %v1217_v39 = vpop.xlane.xlu1 %1216 }
 0x329   : > { %1973 = vrsqrt.f32 %v1234_v7  ;;  %v1235_v30 = vmax.f32 %v1217_v39, 1e-24 }
 0x32a   : > { %v1966_v9 = vpop.eup %1965  ;;  %v1219_v10 = vpop.xlane.xlu0 %1218 }
 0x32b   : > { %1975 = vrsqrt.f32 %v1235_v30  ;;  %v1236_v13 = vmax.f32 %v1219_v10, 1e-24  ;;  %v1264_v22 = vmul.f32 %v1966_v9, %v2606_v50 }
 0x32c   : > { %v1968_v34 = vpop.eup %1967  ;;  %v1221_v20 = vpop.xlane.xlu1 %1220 }
 0x32d   : > { %v1265_v23 = vmul.f32 %v1968_v34, %v2610_v52  ;;  %1977 = vrsqrt.f32 %v1236_v13  ;;  %v1237_v24 = vmax.f32 %v1221_v20, 1e-24 }
 0x32e   : > { %v1970_v17 = vpop.eup %1969 }
 0x32f   : > { %v1635_v25 = vpack.c.bf16 %v1265_v23, %v1264_v22  ;;  %1979 = vrsqrt.f32 %v1237_v24  ;;  %v1262_v15 = vmul.f32 %v1970_v17, %v2612_v53 }
 0x330   : > { %v1972_v26 = vpop.eup %1971 }
 0x331   : > { %1651 = vst [vmem:[%s2412_s0 + $0x28] sm:$0xff] %v1635_v25   ;;  %v1263_v27 = vmul.f32 %v1972_v26, %v2618_v57 }
 0x333   : > { %v1974_v29 = vpop.eup %1973  ;;  %v1630_v32 = vpack.c.bf16 %v1263_v27, %v1262_v15 }
 0x334   : > { %v1266_v52 = vmul.f32 %v1974_v29, %v2632_v11 }
 0x335   : > { %v1976_v50 = vpop.eup %1975  ;;  %1650 = vst [vmem:[%s2412_s0 + $0x20] sm:$0xff] %v1630_v32  }
 0x336   : > { %v1267_v36 = vmul.f32 %v1976_v50, %v2640_v18 }
 0x337   : > { %v1978_v37 = vpop.eup %1977 }
 0x338   : > { %v1640_v40 = vpack.c.bf16 %v1267_v36, %v1266_v52  ;;  %v1268_v53 = vmul.f32 %v1978_v37, %v2636_v14 }
 0x339   : > { %v1980_v41 = vpop.eup %1979 }
 0x33a   : > { %1652 = vst [vmem:[%s2412_s0 + $0x30] sm:$0xff] %v1640_v40   ;;  %v1269_v57 = vmul.f32 %v1980_v41, %v2638_v16 }
 0x33c   : > { %v1645_v11 = vpack.c.bf16 %v1269_v57, %v1268_v53 }
 0x33e   : > { %1653 = vst [vmem:[%s2412_s0 + $0x38] sm:$0xff] %v1645_v11  }
 0x33f   : > { %2080 = shalt.err (!%p2077_p9)
}
 0x340   : > { %s2081_s0 = scalar_lea.hbm %s2682_s14, 1024  ;;  %s2085_s26 = scalar_lea.hbm %s2738_s4, 2048 }
 0x341   : > { %p2082_p11 = scmp.ne.s32.totalorder %s2682_s14, %s2081_s0  ;;  %p2086_p0 = scmp.lt.u32.totalorder %s2682_s14, %s2738_s4 }
 0x342   : > { %p2087_p2 = scmp.lt.u32.totalorder %s2085_s26, %s2081_s0  ;;  %p2089_p8 = scmp.lt.u32.totalorder %s2081_s0, %s2682_s14 }
 0x343   : > { %p2083_p10 = pnand %p2082_p11, %p2777_p4 }
 0x344   : > { %p2088_p7 = por %p2087_p2, %p2086_p0 }
 0x345   : > { %p2084_p13 = pneg %p2083_p10 }
 0x346   : > { %p2090_p6 = por %p2089_p8, %p2088_p7 }
 0x348   : > { %p2091_p5 = pnand %p2090_p6, %p2084_p13 }
 0x34a   : > { %2094 = shalt.err (!%p2091_p5)
}
 0x34b   : > { %s2165_s10 = smov 64   ;;  %s2166_s8 = smov 4  }
 0x34c   : > { %1840 = dma.vmem_to_hbm [thread:$0]  (%p2777_p4), %s2684_s12, 1024, %s2682_s14, %s1351_s18, %s2165_s10, %s2165_s10, %s2166_s8  }
 0x34d PF: > { %s2778_s21 = sld [smem:[#allocation15_spill]]  ;;  %s1381_s29 = sand.u32 1, %s2137_s15  }
 0x34e   : > { %p2779_p12 = scmp.ne.s32.totalorder %s2760_s23, 0  ;;  %s1382_s6 = scalar_lea.sflag [#allocation6], %s1381_s29 }
 0x353   : > { %p2780_p1 = scmp.ge.s32.totalorder %s2778_s21, 2 }
 0x355   : > { %p1854_p3 = pnand %p2780_p1, %p2779_p12 }
 0x357   : > { %2132 = dma.done.wait (!%p1854_p3), %s1382_s6, 1024  }
 0x358   : > { %2134 = vsyncadd (!%p1854_p3), %s1382_s6, 4294966272  ;;  %s21_s20 = sadd.s32 1, %s2778_s21   ;;  %s2781_s15 = smov %s2141_s16 }
 0x359   : > { %p18_p9 = scmp.ge.s32.totalorder %s21_s20, 4   ;;  %s2782_s16 = smov %s2145_s17 }
 0x35a   : > { %s2783_s17 = smov %s2341_s27  ;;  %s2784_s18 = smov %s2153_s19 }
 0x35b   : > { %s2785_s19 = smov %s2787_s30  ;;  %20 = sbr.rel (!%p18_p9) target bundleno = 10 (0xa), region = 117 }
 0x362   :  { %1387 = vsyncpa [#allocation5], 1 }
 0x363   :  { %1389 = vsyncpa [#allocation5 + $0x1], 1 }
 0x364   :  { %1390 = vsyncpa [#allocation8], 1 }
 0x365   :  { %1392 = vsyncpa [#allocation8 + $0x1], 1 }
 0x366   :  { %1393 = vsyncpa [#allocation6], 1 }
 0x367   :  { %1395 = vsyncpa [#allocation6 + $0x1], 1 }

</bundles_post_ra>
